<compile_context>
chip_gen: v5e
topology: v5e:2x2
jax: 0.10.0
libtpu: 0.0.40
codegen_flags: <defaults>
</compile_context>

<pallas_src>
import functools

import jax
import jax.numpy as jnp
from jax import lax
from jax.experimental import pallas as pl
from jax.experimental.pallas import tpu as pltpu


# ----------------------------------------------------------------------------
# Kernels
# ----------------------------------------------------------------------------
def _inproj_kernel(x_ref, wih_ref, b_ref, pre_ref, *, use_bf16):
    """pre = x @ W_ih + b for one time chunk (fully parallel over chunks).

    x_ref  : (tc, Bp, Din)
    wih_ref: (Din, 4*Hp)   transposed weight_ih (gates i,f,g,o, gate-padded)
    b_ref  : (1, 4*Hp)     b_ih + b_hh
    pre_ref: (tc, Bp, 4*Hp)
    """
    tc, bp, din = x_ref.shape
    g = pre_ref.shape[-1]
    x2 = x_ref[...].reshape(tc * bp, din)   # leading-dim collapse: layout-free
    w = wih_ref[...]
    if use_bf16:
        x2 = x2.astype(jnp.bfloat16)
        w = w.astype(jnp.bfloat16)
    pre = jnp.dot(x2, w, preferred_element_type=jnp.float32) + b_ref[...]
    pre_ref[...] = pre.reshape(tc, bp, g)


def _recurrence_kernel(pre_ref, whh_ref, fcw_ref, fcb_ref,
                       y_ref, h_ref, c_ref, fco_ref,
                       *, valid_len, mask_tail, unroll, use_bf16):
    """Serial LSTM recurrence over one (batch-tile, time-chunk) block.

    pre_ref : (tc, BT, 4*Hp)  hoisted input projection for this chunk
    whh_ref : (Hp, 4*Hp)      transposed W_hh
    fcw_ref : (Hp, Op), fcb_ref: (1, Op)  fused fc applied to hn
    y_ref   : (tc, BT, Hp)    per-step hidden states (next layer's input)
    h_ref/c_ref : (BT, Hp)    running state, resident across time chunks
    fco_ref : (BT, Op)        fc(hn), written on the last chunk only
    """
    tc = pre_ref.shape[0]
    hp = whh_ref.shape[0]
    ti = pl.program_id(1)

    # PyTorch default h0 = c0 = 0, only before the first chunk of each tile.
    @pl.when(ti == 0)
    def _():
        h_ref[...] = jnp.zeros_like(h_ref)
        c_ref[...] = jnp.zeros_like(c_ref)

    whh = whh_ref[...]                       # loop-invariant: loaded once
    if use_bf16:
        whh = whh.astype(jnp.bfloat16)
    t0 = ti * tc                             # global step of this chunk's start

    def step(t, carry):
        h_prev, c_prev = carry
        hmat = h_prev.astype(jnp.bfloat16) if use_bf16 else h_prev
        gates = pre_ref[t] + jnp.dot(hmat, whh,
                                     preferred_element_type=jnp.float32)
        i = jax.nn.sigmoid(gates[:, 0 * hp:1 * hp])
        f = jax.nn.sigmoid(gates[:, 1 * hp:2 * hp])
        g = jnp.tanh(gates[:, 2 * hp:3 * hp])
        o = jax.nn.sigmoid(gates[:, 3 * hp:4 * hp])
        c_new = f * c_prev + i * g
        h_new = o * jnp.tanh(c_new)
        if mask_tail:                        # padded tail steps: freeze state
            valid = (t0 + t) < valid_len
            h_new = jnp.where(valid, h_new, h_prev)
            c_new = jnp.where(valid, c_new, c_prev)
        y_ref[t] = h_new
        return h_new, c_new

    # h / c carried in registers across the chunk loop (bounded unroll: the
    # recurrence is strictly serial, full unroll only adds vreg pressure).
    h_fin, c_fin = lax.fori_loop(0, tc, step, (h_ref[...], c_ref[...]),
                                 unroll=unroll)
    h_ref[...] = h_fin
    c_ref[...] = c_fin

    # Fused fc(hn) epilogue: avoids an hn HBM round trip + extra pallas_call.
    @pl.when(ti == pl.num_programs(1) - 1)
    def _():
        fco_ref[...] = (jnp.dot(h_fin, fcw_ref[...],
                                preferred_element_type=jnp.float32)
                        + fcb_ref[...])


# ----------------------------------------------------------------------------
# Sizing helpers (generation-aware)
# ----------------------------------------------------------------------------
def _round_up(v, m):
    return ((v + m - 1) // m) * m


def _vmem_budget_bytes():
    """~75% of physical VMEM (64 MiB on v7x, 128 MiB on v5e/v6e), leaving
    headroom for compiler-internal scratch."""
    cap = 128 * 1024 * 1024
    try:
        info = pltpu.get_tpu_info()
        cap = int(getattr(info, "vmem_capacity_bytes", cap))
    except Exception:
        pass
    return max((cap * 3) // 4, 32 * 1024 * 1024)


def _default_batch_tiles():
    """2 batch tiles on chips where one Pallas program spans two TensorCores
    (megacore v4/v5p, v7x); 1 elsewhere (splitting batch on a 1-TC chip only
    serializes the sublane-parallel recurrence)."""
    try:
        kind = jax.devices()[0].device_kind.lower()
        if ("v4" in kind) or ("v5p" in kind) or ("v7" in kind):
            return 2
    except Exception:
        pass
    return 1


def _proj_bytes(tc, bp, din, hp, wbuf):
    f32 = 4
    return (2 * tc * bp * din * f32            # x chunk (double-buffered)
            + 2 * tc * bp * 4 * hp * f32       # pre chunk out (double-buffered)
            + wbuf * (din + 1) * 4 * hp * f32)  # W_ih + bias


def _recur_bytes(tc, bt, hp, op, wbuf):
    f32 = 4
    return (2 * tc * bt * 4 * hp * f32         # pre chunk in (double-buffered)
            + 2 * tc * bt * hp * f32           # y chunk out (double-buffered)
            + wbuf * hp * 4 * hp * f32         # W_hh
            + wbuf * (hp + 1) * op * f32       # fc weights
            + 2 * 2 * bt * hp * f32            # h, c
            + 2 * bt * op * f32)               # fc(hn)


def _pick_time_chunk(T, bp, bt, dp, hp, op, budget, desired, wbuf):
    """Largest tc <= desired whose per-kernel VMEM footprint fits the budget
    (shrink tc instead of under-reporting the limit)."""
    tc = max(1, min(T, desired))
    din = max(dp, hp)
    while tc > 1:
        need = max(_proj_bytes(tc, bp, din, hp, wbuf),
                   _recur_bytes(tc, bt, hp, op, wbuf))
        if need <= budget:
            break
        tc -= 1
    return tc


def _pad_gate_cols(w, rows_p, H, Hp):
    """Pad a gate-concatenated (r, 4*H) array to (rows_p, 4*Hp): each i/f/g/o
    block padded to Hp so gate slices stay 128-lane aligned."""
    r = w.shape[0]
    w4 = w.reshape(r, 4, H)
    w4 = jnp.pad(w4, ((0, rows_p - r), (0, 0), (0, Hp - H)))
    return w4.reshape(rows_p, 4 * Hp)


# ----------------------------------------------------------------------------
# Forward wrapper
# ----------------------------------------------------------------------------
def _forward(x, params, *, time_chunk, batch_tiles, use_bf16_matmul,
             single_buffer_weights):
    B, T, D = x.shape
    H = params["hidden_size"]
    O = params["output_dim"]
    layers = params["layers"]

    nb = batch_tiles if batch_tiles is not None else _default_batch_tiles()
    if B <= 8:
        nb = 1
    Bp = _round_up(B, 8 * nb)       # sublane padding, divisible into nb tiles
    BT = Bp // nb
    Dp = _round_up(D, 128)          # lane padding
    Hp = _round_up(H, 128)          # lane padding (each gate slice aligned)
    Op = _round_up(O, 128)

    wbuf = 1 if single_buffer_weights else 2
    budget = _vmem_budget_bytes()
    desired = time_chunk if time_chunk is not None else 128
    tc = _pick_time_chunk(T, Bp, BT, Dp, Hp, Op, budget, desired, wbuf)
    Tp = _round_up(T, tc)
    n_chunks = Tp // tc
    mask_tail = Tp != T

    def wspec(shape):
        # Loop-invariant operands: constant index map; single-buffer if allowed.
        if single_buffer_weights:
            return pl.BlockSpec(shape, lambda *_: (0,) * len(shape),
                                pipeline_mode=pl.Buffered(1))
        return pl.BlockSpec(shape, lambda *_: (0,) * len(shape))

    # time-major, pad time/batch/feature dims (zero padding keeps padded gate
    # columns exactly 0 through the recurrence).
    x_t = jnp.transpose(x.astype(jnp.float32), (1, 0, 2))         # (T, B, D)
    x_t = jnp.pad(x_t, ((0, Tp - T), (0, Bp - B), (0, Dp - D)))   # (Tp, Bp, Dp)

    fcw_p = jnp.pad(params["fc_w"], ((0, Hp - H), (0, Op - O)))   # (Hp, Op)
    fcb_p = jnp.pad(params["fc_b"], ((0, 0), (0, Op - O)))        # (1, Op)

    layer_in = x_t
    fc_outs = []
    for li, (wih, whh, b) in enumerate(layers):
        din_p = Dp if li == 0 else Hp
        wih_p = _pad_gate_cols(wih, din_p, H, Hp)                 # (din_p, 4Hp)
        whh_p = _pad_gate_cols(whh, Hp, H, Hp)                    # (Hp, 4Hp)
        b_p = _pad_gate_cols(b, 1, H, Hp)                         # (1, 4Hp)

        # --- input projection: parallel grid, off the serial path -----------
        pre = pl.pallas_call(
            functools.partial(_inproj_kernel, use_bf16=use_bf16_matmul),
            out_shape=jax.ShapeDtypeStruct((Tp, Bp, 4 * Hp), jnp.float32),
            grid_spec=pltpu.PrefetchScalarGridSpec(
                num_scalar_prefetch=0,
                grid=(n_chunks,),
                in_specs=[
                    pl.BlockSpec((tc, Bp, din_p), lambda t: (t, 0, 0)),
                    wspec((din_p, 4 * Hp)),
                    wspec((1, 4 * Hp)),
                ],
                out_specs=pl.BlockSpec((tc, Bp, 4 * Hp), lambda t: (t, 0, 0)),
            ),
            compiler_params=pltpu.CompilerParams(
                dimension_semantics=("parallel",),
                vmem_limit_bytes=budget),
        )(layer_in, wih_p, b_p)

        # --- serial recurrence: (batch "parallel", time "arbitrary") --------
        y, _h, _c, fco = pl.pallas_call(
            functools.partial(_recurrence_kernel,
                              valid_len=T, mask_tail=mask_tail,
                              unroll=min(tc, 8), use_bf16=use_bf16_matmul),
            out_shape=(
                jax.ShapeDtypeStruct((Tp, Bp, Hp), jnp.float32),
                jax.ShapeDtypeStruct((Bp, Hp), jnp.float32),
                jax.ShapeDtypeStruct((Bp, Hp), jnp.float32),
                jax.ShapeDtypeStruct((Bp, Op), jnp.float32),
            ),
            grid_spec=pltpu.PrefetchScalarGridSpec(
                num_scalar_prefetch=0,
                grid=(nb, n_chunks),
                in_specs=[
                    pl.BlockSpec((tc, BT, 4 * Hp), lambda bi, ti: (ti, bi, 0)),
                    wspec((Hp, 4 * Hp)),
                    wspec((Hp, Op)),
                    wspec((1, Op)),
                ],
                out_specs=[
                    pl.BlockSpec((tc, BT, Hp), lambda bi, ti: (ti, bi, 0)),
                    pl.BlockSpec((BT, Hp), lambda bi, ti: (bi, 0)),
                    pl.BlockSpec((BT, Hp), lambda bi, ti: (bi, 0)),
                    pl.BlockSpec((BT, Op), lambda bi, ti: (bi, 0)),
                ],
            ),
            compiler_params=pltpu.CompilerParams(
                dimension_semantics=("parallel", "arbitrary"),
                vmem_limit_bytes=budget),
        )(pre, whh_p, fcw_p, fcb_p)

        fc_outs.append(fco)
        layer_in = y                                              # (Tp, Bp, Hp)

    out = jnp.stack(fc_outs, axis=0)                              # (L, Bp, Op)
    return out[:, :B, :O]                                         # (L, B, O)


def lstm_temporal_extractor(x, params, *, time_chunk=None, batch_tiles=None,
                            use_bf16_matmul=False):
    """Forward pass matching LSTM_temporal_Extractor.forward.

    x: (B, T, input_size), batch_first like nn.LSTM(batch_first=True).
    returns fc(hn) with shape (num_layers, B, linner_output_dim).
    """
    try:
        out = _forward(x, params, time_chunk=time_chunk,
                       batch_tiles=batch_tiles,
                       use_bf16_matmul=use_bf16_matmul,
                       single_buffer_weights=True)
        return jax.block_until_ready(out)
    except Exception:
        # Fallback for jax builds that reject pl.Buffered(1) single-buffering.
        out = _forward(x, params, time_chunk=time_chunk,
                       batch_tiles=batch_tiles,
                       use_bf16_matmul=use_bf16_matmul,
                       single_buffer_weights=False)
        return jax.block_until_ready(out)


# ----------------------------------------------------------------------------
# Parameter init (same shapes / init range as the PyTorch module)
# ----------------------------------------------------------------------------
def init_params(key, input_size, hidden_size, num_layers, linner_output_dim):
    params = {
        "layers": [],
        "hidden_size": hidden_size,
        "output_dim": linner_output_dim,
    }
    scale = 1.0 / (hidden_size ** 0.5)
    for l in range(num_layers):
        d_in = input_size if l == 0 else hidden_size
        key, k1, k2, k3, k4 = jax.random.split(key, 5)
        # Stored transposed: (d_in, 4H) / (H, 4H); gate order i, f, g, o.
        wih = jax.random.uniform(k1, (d_in, 4 * hidden_size), jnp.float32,
                                 -scale, scale)
        whh = jax.random.uniform(k2, (hidden_size, 4 * hidden_size), jnp.float32,
                                 -scale, scale)
        b_ih = jax.random.uniform(k3, (4 * hidden_size,), jnp.float32,
                                  -scale, scale)
        b_hh = jax.random.uniform(k4, (4 * hidden_size,), jnp.float32,
                                  -scale, scale)
        params["layers"].append((wih, whh, (b_ih + b_hh)[None, :]))
    key, k5, k6 = jax.random.split(key, 3)
    params["fc_w"] = jax.random.uniform(
        k5, (hidden_size, linner_output_dim), jnp.float32, -scale, scale)
    params["fc_b"] = jax.random.uniform(
        k6, (1, linner_output_dim), jnp.float32, -scale, scale)
    return params


# ----------------------------------------------------------------------------
# Pure-JAX reference (same math, XLA) for validation
# ----------------------------------------------------------------------------
def _reference_forward(x, params):
    B, T, D = x.shape
    H = params["hidden_size"]
    xs = jnp.transpose(x.astype(jnp.float32), (1, 0, 2))            # (T, B, D)
    hn = []
    layer_in = xs
    for (wih, whh, b) in params["layers"]:
        def step(carry, x_t):
            h, c = carry
            g = (x_t @ wih + b) + h @ whh
            i = jax.nn.sigmoid(g[:, 0 * H:1 * H])
            f = jax.nn.sigmoid(g[:, 1 * H:2 * H])
            gg = jnp.tanh(g[:, 2 * H:3 * H])
            o = jax.nn.sigmoid(g[:, 3 * H:4 * H])
            c = f * c + i * gg
            h = o * jnp.tanh(c)
            return (h, c), h
        init = (jnp.zeros((B, H), jnp.float32), jnp.zeros((B, H), jnp.float32))
        (h_fin, _), ys = lax.scan(step, init, layer_in)
        hn.append(h_fin)
        layer_in = ys
    hn = jnp.stack(hn, axis=0)                                      # (L, B, H)
    return hn @ params["fc_w"] + params["fc_b"]                     # (L, B, O)


if __name__ == "__main__":
    batch = 2
    seq = 8
    input_size = 16
    hidden_size = 32
    num_layers = 2
    linner_output_dim = 8

    key = jax.random.PRNGKey(0)
    key, kx, kx2, kp = jax.random.split(key, 4)
    x = jax.random.normal(kx, (batch, seq, input_size), jnp.float32)
    params = init_params(kp, input_size, hidden_size, num_layers,
                         linner_output_dim)

    # 1) fp32 path, multi-chunk resident h/c grid (time_chunk=4 -> 2 chunks).
    out = lstm_temporal_extractor(x, params, time_chunk=4)
    out = jax.block_until_ready(out)
    assert out.shape == (num_layers, batch, linner_output_dim), out.shape
    ref = jax.block_until_ready(_reference_forward(x, params))
    err = float(jnp.max(jnp.abs(out - ref)))
    assert jnp.allclose(out, ref, atol=1e-4, rtol=1e-4), err

    # 2) batch-tiled "parallel" axis (2 tiles) + padded/masked time tail (T=7).
    x2 = jax.random.normal(kx2, (16, 7, input_size), jnp.float32)
    out2 = jax.block_until_ready(
        lstm_temporal_extractor(x2, params, time_chunk=4, batch_tiles=2))
    assert out2.shape == (num_layers, 16, linner_output_dim), out2.shape
    ref2 = jax.block_until_ready(_reference_forward(x2, params))
    err2 = float(jnp.max(jnp.abs(out2 - ref2)))
    assert jnp.allclose(out2, ref2, atol=1e-4, rtol=1e-4), err2

    # 3) opt-in bf16 matmul operands (fp32 accumulation), loose tolerance.
    out3 = jax.block_until_ready(
        lstm_temporal_extractor(x, params, use_bf16_matmul=True))
    err3 = float(jnp.max(jnp.abs(out3 - ref)))
    assert err3 < 5e-2, err3

    print("KERNEL_OK")
</pallas_src>

<mosaic_0001>
module attributes {stable_mosaic.version = 11 : i64} {
  func.func @_inproj_kernel(%arg0: i32, %arg1: memref<4x8x128xf32, #tpu.memory_space<vmem>>, %arg2: memref<128x512xf32, #tpu.memory_space<vmem>>, %arg3: memref<1x512xf32, #tpu.memory_space<vmem>>, %arg4: memref<4x8x512xf32, #tpu.memory_space<vmem>>) attributes {dimension_semantics = [#tpu.dimension_semantics<parallel>], iteration_bounds = array<i64: 2>, scalar_prefetch = 0 : i64, scratch_operands = 0 : i64, tpu.core_type = #tpu.core_type<tc>, window_params = [{transform_indices = @transform_0, window_bounds = array<i64: 4, 8, 128>}, {pipeline_mode = #tpu.pipeline_mode<synchronous>, transform_indices = @transform_1, window_bounds = array<i64: 128, 512>}, {pipeline_mode = #tpu.pipeline_mode<synchronous>, transform_indices = @transform_2, window_bounds = array<i64: 1, 512>}, {transform_indices = @transform_3, window_bounds = array<i64: 4, 8, 512>}]} {
    %c0 = arith.constant 0 : index
    %c0_0 = arith.constant 0 : index
    %c0_1 = arith.constant 0 : index
    %0 = vector.load %arg1[%c0, %c0_0, %c0_1] : memref<4x8x128xf32, #tpu.memory_space<vmem>>, vector<4x8x128xf32>
    %1 = vector.shape_cast %0 : vector<4x8x128xf32> to vector<32x128xf32>
    %c0_2 = arith.constant 0 : index
    %c0_3 = arith.constant 0 : index
    %2 = vector.load %arg2[%c0_2, %c0_3] : memref<128x512xf32, #tpu.memory_space<vmem>>, vector<128x512xf32>
    %cst = arith.constant dense<0.000000e+00> : vector<32x512xf32>
    %3 = tpu.matmul %1, %2, %cst {dimension_numbers = #tpu.dot_dimension_numbers<[1], [0], [0], [1], [0, 0, 1, 1], [], []>} : vector<32x128xf32>, vector<128x512xf32>, vector<32x512xf32> -> vector<32x512xf32>
    %c0_4 = arith.constant 0 : index
    %c0_5 = arith.constant 0 : index
    %4 = vector.load %arg3[%c0_4, %c0_5] : memref<1x512xf32, #tpu.memory_space<vmem>>, vector<1x512xf32>
    %5 = vector.broadcast %4 : vector<1x512xf32> to vector<32x512xf32>
    %6 = arith.addf %3, %5 : vector<32x512xf32>
    %7 = vector.shape_cast %6 : vector<32x512xf32> to vector<4x8x512xf32>
    %c0_6 = arith.constant 0 : index
    %c0_7 = arith.constant 0 : index
    %c0_8 = arith.constant 0 : index
    %8 = vector.load %arg4[%c0_6, %c0_7, %c0_8] : memref<4x8x512xf32, #tpu.memory_space<vmem>>, vector<4x8x512xf32>
    tpu.vector_store %arg4[%c0_6, %c0_7, %c0_8], %7 {strides = array<i32>} : memref<4x8x512xf32, #tpu.memory_space<vmem>>, vector<4x8x512xf32>,
    return
  }
  func.func @transform_0(%arg0: i32) -> (i32, i32, i32) {
    %c0_i32 = arith.constant 0 : i32
    %c0_i32_0 = arith.constant 0 : i32
    %c0_i32_1 = arith.constant 0 : i32
    return %arg0, %c0_i32, %c0_i32_0 : i32, i32, i32
  }
  func.func @transform_1(%arg0: i32) -> (i32, i32) {
    %c0_i32 = arith.constant 0 : i32
    %c0_i32_0 = arith.constant 0 : i32
    %c0_i32_1 = arith.constant 0 : i32
    return %c0_i32, %c0_i32_0 : i32, i32
  }
  func.func @transform_2(%arg0: i32) -> (i32, i32) {
    %c0_i32 = arith.constant 0 : i32
    %c0_i32_0 = arith.constant 0 : i32
    %c0_i32_1 = arith.constant 0 : i32
    return %c0_i32, %c0_i32_0 : i32, i32
  }
  func.func @transform_3(%arg0: i32) -> (i32, i32, i32) {
    %c0_i32 = arith.constant 0 : i32
    %c0_i32_0 = arith.constant 0 : i32
    %c0_i32_1 = arith.constant 0 : i32
    return %arg0, %c0_i32, %c0_i32_0 : i32, i32, i32
  }
}

module attributes {stable_mosaic.version = 11 : i64} {
  func.func @_inproj_kernel(%arg0: i32, %arg1: memref<4x8x128xf32, #tpu.memory_space<vmem>>, %arg2: memref<128x512xf32, #tpu.memory_space<vmem>>, %arg3: memref<1x512xf32, #tpu.memory_space<vmem>>, %arg4: memref<4x8x512xf32, #tpu.memory_space<vmem>>) attributes {dimension_semantics = [#tpu.dimension_semantics<parallel>], iteration_bounds = array<i64: 2>, scalar_prefetch = 0 : i64, scratch_operands = 0 : i64, tpu.core_type = #tpu.core_type<tc>, window_params = [{transform_indices = @transform_0, window_bounds = array<i64: 4, 8, 128>}, {pipeline_mode = #tpu.pipeline_mode<synchronous>, transform_indices = @transform_1, window_bounds = array<i64: 128, 512>}, {pipeline_mode = #tpu.pipeline_mode<synchronous>, transform_indices = @transform_2, window_bounds = array<i64: 1, 512>}, {transform_indices = @transform_3, window_bounds = array<i64: 4, 8, 512>}]} {
    %c0 = arith.constant 0 : index
    %c0_0 = arith.constant 0 : index
    %c0_1 = arith.constant 0 : index
    %0 = vector.load %arg1[%c0, %c0_0, %c0_1] : memref<4x8x128xf32, #tpu.memory_space<vmem>>, vector<4x8x128xf32>
    %1 = vector.shape_cast %0 : vector<4x8x128xf32> to vector<32x128xf32>
    %c0_2 = arith.constant 0 : index
    %c0_3 = arith.constant 0 : index
    %2 = vector.load %arg2[%c0_2, %c0_3] : memref<128x512xf32, #tpu.memory_space<vmem>>, vector<128x512xf32>
    %cst = arith.constant dense<0.000000e+00> : vector<32x512xf32>
    %3 = tpu.matmul %1, %2, %cst {dimension_numbers = #tpu.dot_dimension_numbers<[1], [0], [0], [1], [0, 0, 1, 1], [], []>} : vector<32x128xf32>, vector<128x512xf32>, vector<32x512xf32> -> vector<32x512xf32>
    %c0_4 = arith.constant 0 : index
    %c0_5 = arith.constant 0 : index
    %4 = vector.load %arg3[%c0_4, %c0_5] : memref<1x512xf32, #tpu.memory_space<vmem>>, vector<1x512xf32>
    %5 = vector.broadcast %4 : vector<1x512xf32> to vector<32x512xf32>
    %6 = arith.addf %3, %5 : vector<32x512xf32>
    %7 = vector.shape_cast %6 : vector<32x512xf32> to vector<4x8x512xf32>
    %c0_6 = arith.constant 0 : index
    %c0_7 = arith.constant 0 : index
    %c0_8 = arith.constant 0 : index
    %8 = vector.load %arg4[%c0_6, %c0_7, %c0_8] : memref<4x8x512xf32, #tpu.memory_space<vmem>>, vector<4x8x512xf32>
    tpu.vector_store %arg4[%c0_6, %c0_7, %c0_8], %7 {strides = array<i32>} : memref<4x8x512xf32, #tpu.memory_space<vmem>>, vector<4x8x512xf32>,
    return
  }
  func.func @transform_0(%arg0: i32) -> (i32, i32, i32) {
    %c0_i32 = arith.constant 0 : i32
    %c0_i32_0 = arith.constant 0 : i32
    %c0_i32_1 = arith.constant 0 : i32
    return %arg0, %c0_i32, %c0_i32_0 : i32, i32, i32
  }
  func.func @transform_1(%arg0: i32) -> (i32, i32) {
    %c0_i32 = arith.constant 0 : i32
    %c0_i32_0 = arith.constant 0 : i32
    %c0_i32_1 = arith.constant 0 : i32
    return %c0_i32, %c0_i32_0 : i32, i32
  }
  func.func @transform_2(%arg0: i32) -> (i32, i32) {
    %c0_i32 = arith.constant 0 : i32
    %c0_i32_0 = arith.constant 0 : i32
    %c0_i32_1 = arith.constant 0 : i32
    return %c0_i32, %c0_i32_0 : i32, i32
  }
  func.func @transform_3(%arg0: i32) -> (i32, i32, i32) {
    %c0_i32 = arith.constant 0 : i32
    %c0_i32_0 = arith.constant 0 : i32
    %c0_i32_1 = arith.constant 0 : i32
    return %arg0, %c0_i32, %c0_i32_0 : i32, i32, i32
  }
}

</mosaic_0001>

<bundles_post_ra>
// kernel: tpu_custom_call.1
= control target key start
LH: loop header
LB: loop body
LE: loop exit
PB: predicated region body
PF: predicated region fallthrough
CT: control target
= control target key end

     0   :  { %8 = vsyncpa [#allocation3], 0  ;;  %s995_s0 = inlined_call_operand.hbm [shape: f32[8,8,128], index: 0, kind: input, shape index: {}]   ;;  %s996_s1 = inlined_call_operand.hbm [shape: f32[128,512], index: 1, kind: input, shape index: {}]   ;;  %s997_s2 = inlined_call_operand.hbm [shape: f32[1,512], index: 2, kind: input, shape index: {}]   ;;  %s998_s3 = inlined_call_operand.hbm [shape: f32[8,8,512], index: 3, kind: output, shape index: {}]  }
   0x1   :  { %10 = vsyncpa [#allocation3 + $0x1], 0 }
   0x2   :  { %11 = vsyncpa [#allocation6], 0 }
   0x3   :  { %12 = vsyncpa [#allocation4], 0 }
   0x4   :  { %14 = vsyncpa [#allocation4 + $0x1], 0  ;;  %s828_s12 = smov 0   ;;  %s830_s13 = smov 0  }
   0x5   :  { %s832_s14 = smov 0   ;;  %s834_s15 = smov 0  }
   0x6 LB: > { %s849_s16 = sadd.s32 4294967295, %s798_s15   ;;  %s543_s17 = sadd.s32 4294967294, %s798_s15   ;;  %s798_s15 = sphi %s834_s15, %s1008_s15   ;;  %s794_s14 = sphi %s832_s14, %s1007_s14   ;;  %s790_s13 = sphi %s830_s13, %s1006_s13   ;;  %s786_s12 = sphi %s828_s12, %s1005_s12  }
   0x7   : > { %p40_p0 = scmp.ne.s32.totalorder %s790_s13, %s786_s12  ;;  %p41_p1 = scmp.eq.s32.totalorder %s849_s16, 0 }
   0x8   : > { %p106_p2 = scmp.eq.s32.totalorder %s849_s16, 1  ;;  %p112_p3 = scmp.eq.s32.totalorder %s543_s17, 1 }
   0x9   : > { %p858_p4 = por %p41_p1, %p40_p0  ;;  %p544_p5 = scmp.ge.s32.totalorder %s798_s15, 1 }
   0xa   : > { %p863_p6 = por %p112_p3, %p40_p0  ;;  %p119_p7 = scmp.lt.s32.totalorder %s798_s15, 3 }
   0xb   : > { %s130_s22 = sshll.u32 %s996_s1, 4  ;;  %s800_s24 = smov [#allocation5]   ;;  %s131_s22 = int_to_ptr.hbm [resolvable:$true] %s130_s22 }
   0xc   : > { %p871_p8 = pnand %p544_p5, %p119_p7  ;;  %s132_s25 = sshll.u32 %s800_s24, 4  ;;  %s133_s25 = int_to_ptr.vmem [resolvable:$true] %s132_s25 }
   0xd   : > { %s145_s28 = sshll.u32 %s997_s2, 4  ;;  %s801_s29 = smov 512   ;;  %s146_s28 = int_to_ptr.hbm [resolvable:$true] %s145_s28 }
   0xe   : > { %p577_p9 = pneg %p871_p8  ;;  %s802_s30 = smov 32  }
   0xf   : > { %s803_s4 = smov [#allocation7]   ;;  %s884_s6 = sadd.s32 1, %s798_s15  }
  0x10   : > { %p578_p10 = pnand %p577_p9, %p41_p1  ;;  %s147_s5 = sshll.u32 %s803_s4, 4  ;;  %s148_s5 = int_to_ptr.vmem [resolvable:$true] %s147_s5 }
  0x11   : > { %s27_s7 = sadd.s32 1, %s794_s14  ;;  %s24_s8 = ssub.s32 %s798_s15, %s884_s6 }
  0x12   : > { %580 = dma.hbm_to_vmem [thread:$0]  (!%p578_p10), %s131_s22, 8192, %s133_s25, [#allocation6], %s801_s29, %s801_s29, %s802_s30  }
  0x13   : > { %583 = dma.hbm_to_vmem [thread:$0]  (!%p578_p10), %s146_s28, 64, %s148_s5, [#allocation6]  }
  0x14   : > { %p34_p12 = scmp.ne.s32.totalorder %s794_s14, %s790_s13  ;;  %p25_p13 = scmp.eq.s32.totalorder %s24_s8, 0 }
  0x15   : > { %p35_p0 = scmp.eq.s32.totalorder %s798_s15, 0  ;;  %p594_p5 = scmp.lt.s32.totalorder %s798_s15, 2 }
  0x16   : > { %p894_p3 = por %p106_p2, %p34_p12  ;;  %s158_s11 = sand.u32 1, %s794_s14  }
  0x17   : > { %s900_s10 = scalar_select %p25_p13, %s794_s14, %s27_s7  }
  0x18   : > { %p36_p7 = por %p35_p0, %p34_p12  ;;  %s548_s17 = sshll.u32 %s158_s11, 5 }
  0x19   : > { %s562_s20 = sshll.u32 %s798_s15, 5  ;;  %s162_s25 = scalar_lea.vmem [#allocation2], %s548_s17 }
  0x1a   : > { %s167_s24 = scalar_lea.hbm %s995_s0, %s562_s20  ;;  %s170_s26 = sshll.u32 %s162_s25, 4  ;;  %s171_s26 = int_to_ptr.vmem [resolvable:$true] %s170_s26 }
  0x1b   : > { %s168_s27 = sshll.u32 %s167_s24, 4  ;;  %p907_p2 = pnand %p594_p5, %p36_p7  ;;  %s169_s27 = int_to_ptr.hbm [resolvable:$true] %s168_s27 }
  0x1c   : > { %s159_s29 = scalar_lea.sflag [#allocation3], %s158_s11  ;;  %s698_s30 = sshra.s32 %s169_s27, 4  ;;  %s699_s30 = int_to_ptr.hbm [resolvable:$true] %s698_s30 }
  0x1d   : > { %s700_s4 = scalar_lea.hbm %s699_s30, 32  ;;  %p702_p10 = pneg %p907_p2 }
  0x1e   : > { %p701_p9 = scmp.ne.s32.totalorder %s699_s30, %s700_s4  ;;  %s705_s8 = scalar_lea.hbm %s995_s0, 64 }
  0x1f   : > { %p706_p0 = scmp.lt.s32.totalorder %s699_s30, %s995_s0  ;;  %p707_p5 = scmp.lt.s32.totalorder %s705_s8, %s700_s4 }
  0x20   : > { %p703_p12 = pnand %p702_p10, %p701_p9 }
  0x21   : > { %p708_p7 = por %p707_p5, %p706_p0 }
  0x22   : > { %p704_p13 = pneg %p703_p12 }
  0x24   : > { %p709_p11 = pnand %p708_p7, %p704_p13 }
  0x26   : > { %712 = shalt.err (!%p709_p11)
}
  0x27   : > { %s804_s11 = smov 128   ;;  %s805_s21 = smov 8  }
  0x28   : > { %587 = dma.hbm_to_vmem [thread:$0]  (!%p907_p2), %s169_s27, 512, %s171_s26, %s159_s29, %s804_s11, %s804_s11, %s805_s21  }
  0x29   : > { %182 = sbr.rel (%p871_p8) target bundleno = 244 (0xf4), region = 32  ;;  %s924_s22 = sand.u32 (!%p871_p8), 1, %s790_s13  }
  0x2a   : > { %s552_s24 = sshll.u32 (!%p871_p8), %s924_s22, 5  ;;  %s185_s25 = scalar_lea.sflag (!%p871_p8), [#allocation3], %s924_s22 }
  0x2b   : > { %s928_s30 = scalar_lea.vmem (!%p871_p8), [#allocation2], %s552_s24 }
  0x2e   : > { %773 = dma.done.wait (%p858_p4), %s185_s25, 512  }
  0x2f   : > { %775 = vsyncadd (%p858_p4), %s185_s25, 4294966784 }
  0x30   : > { %777 = dma.done.wait (%p41_p1), [#allocation6], 8256  }
  0x31   : > { %779 = vsyncadd (%p41_p1), [#allocation6], 4294959040  ;;  %v290_v0 = vld [vmem:[#allocation5 + $0x1f0] sm:$0xff]  ;;  %v291_v1 = vld [vmem:[#allocation5 + $0x1f8] sm:$0xff]  ;;  %s555_s18 = sshll.u32 %s924_s22, 7  ;;  %s564_s26 = sshll.u32 %s849_s16, 7 }
  0x32   : > { %v286_v2 = vld [vmem:[#allocation5 + $0x1d0] sm:$0xff]  ;;  %360 = vmatpush.msra.mxu2 %v290_v0  ;;  %389 = vmatpush.msra.mxu3 %v291_v1  ;;  %v287_v3 = vld [vmem:[#allocation5 + $0x1d8] sm:$0xff]  ;;  %v288_v6 = vld [vmem:[#allocation5 + $0x1e0] sm:$0xff]  ;;  %s943_s23 = scalar_lea.vmem [#allocation8], %s555_s18  ;;  %s447_s29 = scalar_lea.hbm %s998_s3, %s564_s26 }
  0x33   : > { %v282_v4 = vld [vmem:[#allocation5 + $0x1b0] sm:$0xff]  ;;  %v283_v5 = vld [vmem:[#allocation5 + $0x1b8] sm:$0xff]  ;;  %v289_v7 = vld [vmem:[#allocation5 + $0x1e8] sm:$0xff]  ;;  %302 = vmatpush.msra.mxu0 %v288_v6  ;;  %s448_s4 = sshll.u32 %s943_s23, 4  ;;  %s450_s5 = sshll.u32 %s447_s29, 4  ;;  %s449_s4 = int_to_ptr.vmem [resolvable:$true] %s448_s4  ;;  %s451_s5 = int_to_ptr.hbm [resolvable:$true] %s450_s5 }
  0x34   : > { %361 = vmatpush.msra.mxu2 %v286_v2  ;;  %390 = vmatpush.msra.mxu3 %v287_v3  ;;  %v284_v8 = vld [vmem:[#allocation5 + $0x1c0] sm:$0xff]  ;;  %v285_v9 = vld [vmem:[#allocation5 + $0x1c8] sm:$0xff]  ;;  %v278_v10 = vld [vmem:[#allocation5 + $0x190] sm:$0xff]  ;;  %s435_s16 = scalar_lea.sflag [#allocation4], %s924_s22  ;;  %s742_s7 = sshra.s32 %s451_s5, 4  ;;  %s743_s7 = int_to_ptr.hbm [resolvable:$true] %s742_s7 }
  0x35   : > { %331 = vmatpush.msra.mxu1 %v289_v7  ;;  %v279_v11 = vld [vmem:[#allocation5 + $0x198] sm:$0xff]  ;;  %v280_v12 = vld [vmem:[#allocation5 + $0x1a0] sm:$0xff]  ;;  %v281_v13 = vld [vmem:[#allocation5 + $0x1a8] sm:$0xff]  ;;  %303 = vmatpush.msra.mxu0 %v284_v8  ;;  %s744_s8 = scalar_lea.hbm %s743_s7, 128  ;;  %s748_s11 = scalar_lea.hbm %s998_s3, 256 }
  0x36   : > { %362 = vmatpush.msra.mxu2 %v282_v4  ;;  %391 = vmatpush.msra.mxu3 %v283_v5  ;;  %v274_v14 = vld [vmem:[#allocation5 + $0x170] sm:$0xff]  ;;  %v275_v15 = vld [vmem:[#allocation5 + $0x178] sm:$0xff]  ;;  %v276_v16 = vld [vmem:[#allocation5 + $0x180] sm:$0xff]  ;;  %p745_p1 = scmp.ne.s32.totalorder %s743_s7, %s744_s8  ;;  %p749_p11 = scmp.lt.s32.totalorder %s743_s7, %s998_s3 }
  0x37   : > { %332 = vmatpush.msra.mxu1 %v285_v9  ;;  %v277_v17 = vld [vmem:[#allocation5 + $0x188] sm:$0xff]  ;;  %304 = vmatpush.msra.mxu0 %v280_v12  ;;  %v270_v18 = vld [vmem:[#allocation5 + $0x150] sm:$0xff]  ;;  %v271_v19 = vld [vmem:[#allocation5 + $0x158] sm:$0xff]  ;;  %p750_p2 = scmp.lt.s32.totalorder %s748_s11, %s744_s8 }
  0x38   : > { %363 = vmatpush.msra.mxu2 %v278_v10  ;;  %392 = vmatpush.msra.mxu3 %v279_v11  ;;  %v272_v20 = vld [vmem:[#allocation5 + $0x160] sm:$0xff]  ;;  %v273_v21 = vld [vmem:[#allocation5 + $0x168] sm:$0xff]  ;;  %v266_v22 = vld [vmem:[#allocation5 + $0x130] sm:$0xff]  ;;  %p746_p4 = pnand %p745_p1, %p894_p3 }
  0x39   : > { %333 = vmatpush.msra.mxu1 %v281_v13  ;;  %305 = vmatpush.msra.mxu0 %v276_v16  ;;  %v267_v23 = vld [vmem:[#allocation5 + $0x138] sm:$0xff]  ;;  %v268_v24 = vld [vmem:[#allocation5 + $0x140] sm:$0xff]  ;;  %v269_v25 = vld [vmem:[#allocation5 + $0x148] sm:$0xff]  ;;  %p751_p9 = por %p750_p2, %p749_p11 }
  0x3a   : > { %364 = vmatpush.msra.mxu2 %v274_v14  ;;  %393 = vmatpush.msra.mxu3 %v275_v15  ;;  %v262_v26 = vld [vmem:[#allocation5 + $0x110] sm:$0xff]  ;;  %v263_v27 = vld [vmem:[#allocation5 + $0x118] sm:$0xff]  ;;  %v264_v28 = vld [vmem:[#allocation5 + $0x120] sm:$0xff]  ;;  %p747_p8 = pneg %p746_p4 }
  0x3b   : > { %334 = vmatpush.msra.mxu1 %v277_v17  ;;  %306 = vmatpush.msra.mxu0 %v272_v20  ;;  %v265_v29 = vld [vmem:[#allocation5 + $0x128] sm:$0xff]  ;;  %v258_v30 = vld [vmem:[#allocation5 + $0xf0] sm:$0xff]  ;;  %v259_v31 = vld [vmem:[#allocation5 + $0xf8] sm:$0xff] }
  0x3c   : > { %365 = vmatpush.msra.mxu2 %v270_v18  ;;  %394 = vmatpush.msra.mxu3 %v271_v19  ;;  %v260_v32 = vld [vmem:[#allocation5 + $0x100] sm:$0xff]  ;;  %v261_v33 = vld [vmem:[#allocation5 + $0x108] sm:$0xff]  ;;  %v254_v34 = vld [vmem:[#allocation5 + $0xd0] sm:$0xff]  ;;  %p752_p10 = pnand %p751_p9, %p747_p8 }
  0x3d   : > { %335 = vmatpush.msra.mxu1 %v273_v21  ;;  %307 = vmatpush.msra.mxu0 %v268_v24  ;;  %v255_v35 = vld [vmem:[#allocation5 + $0xd8] sm:$0xff]  ;;  %v256_v36 = vld [vmem:[#allocation5 + $0xe0] sm:$0xff]  ;;  %v257_v37 = vld [vmem:[#allocation5 + $0xe8] sm:$0xff] }
  0x3e   : > { %366 = vmatpush.msra.mxu2 %v266_v22  ;;  %395 = vmatpush.msra.mxu3 %v267_v23  ;;  %v250_v38 = vld [vmem:[#allocation5 + $0xb0] sm:$0xff]  ;;  %v251_v39 = vld [vmem:[#allocation5 + $0xb8] sm:$0xff]  ;;  %v252_v40 = vld [vmem:[#allocation5 + $0xc0] sm:$0xff] }
  0x3f   : > { %336 = vmatpush.msra.mxu1 %v269_v25  ;;  %308 = vmatpush.msra.mxu0 %v264_v28  ;;  %v253_v41 = vld [vmem:[#allocation5 + $0xc8] sm:$0xff]  ;;  %v246_v42 = vld [vmem:[#allocation5 + $0x90] sm:$0xff]  ;;  %v247_v43 = vld [vmem:[#allocation5 + $0x98] sm:$0xff] }
  0x40   : > { %367 = vmatpush.msra.mxu2 %v262_v26  ;;  %396 = vmatpush.msra.mxu3 %v263_v27  ;;  %v248_v44 = vld [vmem:[#allocation5 + $0xa0] sm:$0xff]  ;;  %v249_v45 = vld [vmem:[#allocation5 + $0xa8] sm:$0xff]  ;;  %v242_v46 = vld [vmem:[#allocation5 + $0x70] sm:$0xff] }
  0x41   : > { %337 = vmatpush.msra.mxu1 %v265_v29  ;;  %309 = vmatpush.msra.mxu0 %v260_v32  ;;  %v243_v47 = vld [vmem:[#allocation5 + $0x78] sm:$0xff]  ;;  %v244_v48 = vld [vmem:[#allocation5 + $0x80] sm:$0xff]  ;;  %v245_v49 = vld [vmem:[#allocation5 + $0x88] sm:$0xff] }
  0x42   : > { %368 = vmatpush.msra.mxu2 %v258_v30  ;;  %397 = vmatpush.msra.mxu3 %v259_v31  ;;  %v238_v50 = vld [vmem:[#allocation5 + $0x50] sm:$0xff]  ;;  %v239_v51 = vld [vmem:[#allocation5 + $0x58] sm:$0xff]  ;;  %v240_v52 = vld [vmem:[#allocation5 + $0x60] sm:$0xff] }
  0x43   : > { %338 = vmatpush.msra.mxu1 %v261_v33  ;;  %310 = vmatpush.msra.mxu0 %v256_v36  ;;  %v241_v53 = vld [vmem:[#allocation5 + $0x68] sm:$0xff]  ;;  %v234_v54 = vld [vmem:[#allocation5 + $0x30] sm:$0xff]  ;;  %v235_v55 = vld [vmem:[#allocation5 + $0x38] sm:$0xff] }
  0x44   : > { %369 = vmatpush.msra.mxu2 %v254_v34  ;;  %398 = vmatpush.msra.mxu3 %v255_v35  ;;  %v236_v56 = vld [vmem:[#allocation5 + $0x40] sm:$0xff]  ;;  %v237_v57 = vld [vmem:[#allocation5 + $0x48] sm:$0xff]  ;;  %v230_v58 = vld [vmem:[#allocation5 + $0x10] sm:$0xff] }
  0x45   : > { %339 = vmatpush.msra.mxu1 %v257_v37  ;;  %311 = vmatpush.msra.mxu0 %v252_v40  ;;  %v231_v59 = vld [vmem:[#allocation5 + $0x18] sm:$0xff]  ;;  %v224_v60 = vld [vmem:[%s928_s30] sm:$0xff]  ;;  %v233_v62 = vld [vmem:[#allocation5 + $0x28] sm:$0xff] }
  0x46   : > { %370 = vmatpush.msra.mxu2 %v250_v38  ;;  %399 = vmatpush.msra.mxu3 %v251_v39  ;;  %v232_v61 = vld [vmem:[#allocation5 + $0x20] sm:$0xff]  ;;  %v229_v0 = vld [vmem:[#allocation5 + $0x8] sm:$0xff]  ;;  %v226_v2 = vld [vmem:[%s928_s30 + $0x10] sm:$0xff] }
  0x47   : > { %340 = vmatpush.msra.mxu1 %v253_v41  ;;  %312 = vmatpush.msra.mxu0 %v248_v44  ;;  %v228_v63 = vld [vmem:[#allocation5] sm:$0xff]  ;;  %v225_v1 = vld [vmem:[%s928_s30 + $0x8] sm:$0xff]  ;;  %v227_v3 = vld [vmem:[%s928_s30 + $0x18] sm:$0xff] }
  0x48   : > { %371 = vmatpush.msra.mxu2 %v246_v42  ;;  %400 = vmatpush.msra.mxu3 %v247_v43  ;;  %v292_v4 = vld [vmem:[#allocation7] sm:$0xf] }
  0x49   : > { %341 = vmatpush.msra.mxu1 %v249_v45  ;;  %313 = vmatpush.msra.mxu0 %v244_v48  ;;  %v294_v5 = vperm.slane %v292_v4, 0  ;;  %v295_v6 = vperm.slane %v292_v4, 1  ;;  %v296_v7 = vperm.slane %v292_v4, 2  ;;  %v297_v8 = vperm.slane %v292_v4, 3 }
  0x4a   : > { %372 = vmatpush.msra.mxu2 %v242_v46  ;;  %401 = vmatpush.msra.mxu3 %v243_v47 }
  0x4b   : > { %342 = vmatpush.msra.mxu1 %v245_v49  ;;  %314 = vmatpush.msra.mxu0 %v240_v52 }
  0x4c   : > { %373 = vmatpush.msra.mxu2 %v238_v50  ;;  %402 = vmatpush.msra.mxu3 %v239_v51 }
  0x4d   : > { %343 = vmatpush.msra.mxu1 %v241_v53  ;;  %315 = vmatpush.msra.mxu0 %v236_v56 }
  0x4e   : > { %374 = vmatpush.msra.mxu2 %v234_v54  ;;  %403 = vmatpush.msra.mxu3 %v235_v55 }
  0x4f   : > { %344 = vmatpush.msra.mxu1 %v237_v57  ;;  %316 = vmatpush.msra.mxu0 %v232_v61 }
  0x50   : > { %375 = vmatpush.msra.mxu2 %v230_v58  ;;  %404 = vmatpush.msra.mxu3 %v231_v59 }
  0x51   : > { %376 = vmatmul.f32.vlgmr.msra.gmra.mxu2 %v224_v60  ;;  %405 = vmatmul.f32.vlgmr.msra.gmra.mxu3 %v224_v60 }
  0x52   : > { %345 = vmatpush.msra.mxu1 %v233_v62  ;;  %317 = vmatpush.msra.mxu0 %v228_v63 }
  0x53   : > { %318 = vmatmul.f32.vlgmr.msra.gmra.mxu0 %v224_v60 }
  0x54   : > { %346 = vmatpush.msra.mxu1 %v229_v0 }
  0x55   : > { %347 = vmatmul.f32.vlgmr.msra.gmra.mxu1 %v224_v60 }
  0x59   : > { %379 = vmatmul.f32.gmra.mxu2 %v225_v1  ;;  %408 = vmatmul.f32.gmra.mxu3 %v225_v1 }
  0x5b   : > { %321 = vmatmul.f32.gmra.mxu0 %v225_v1 }
  0x5d   : > { %350 = vmatmul.f32.gmra.mxu1 %v225_v1 }
  0x61   : > { %382 = vmatmul.f32.gmra.mxu2 %v226_v2  ;;  %411 = vmatmul.f32.gmra.mxu3 %v226_v2 }
  0x63   : > { %324 = vmatmul.f32.gmra.mxu0 %v226_v2 }
  0x65   : > { %353 = vmatmul.f32.gmra.mxu1 %v226_v2 }
  0x69   : > { %385 = vmatmul.f32.gmra.mxu2 %v227_v3  ;;  %414 = vmatmul.f32.gmra.mxu3 %v227_v3 }
  0x6b   : > { %327 = vmatmul.f32.gmra.mxu0 %v227_v3 }
  0x6d   : > { %356 = vmatmul.f32.gmra.mxu1 %v227_v3 }
  0xd0   : > { %v319_v9 = vpop.f32.mrf.mxu0 }
  0xd1   : > { %v320_v11 = vadd.f32 %v319_v9, %v294_v5 }
  0xd2   : > { %v348_v10 = vpop.f32.mrf.mxu1 }
  0xd3   : > { %v349_v12 = vadd.f32 %v348_v10, %v295_v6  ;;  %418 = vst [vmem:[%s943_s23] sm:$0xff] %v320_v11 }
  0xd4   : > { %v377_v13 = vpop.f32.mrf.mxu2  ;;  %v406_v14 = vpop.f32.mrf.mxu3 }
  0xd5   : > { %v378_v15 = vadd.f32 %v377_v13, %v296_v7  ;;  %v407_v16 = vadd.f32 %v406_v14, %v297_v8  ;;  %419 = vst [vmem:[%s943_s23 + $0x8] sm:$0xff] %v349_v12 }
  0xd7   : > { %420 = vst [vmem:[%s943_s23 + $0x10] sm:$0xff] %v378_v15 }
  0xd8   : > { %421 = vst [vmem:[%s943_s23 + $0x18] sm:$0xff] %v407_v16  ;;  %v322_v17 = vpop.f32.mrf.mxu0 }
  0xd9   : > { %v323_v19 = vadd.f32 %v322_v17, %v294_v5 }
  0xda   : > { %v351_v18 = vpop.f32.mrf.mxu1 }
  0xdb   : > { %v352_v20 = vadd.f32 %v351_v18, %v295_v6  ;;  %422 = vst [vmem:[%s943_s23 + $0x20] sm:$0xff] %v323_v19 }
  0xdc   : > { %v380_v21 = vpop.f32.mrf.mxu2  ;;  %v409_v22 = vpop.f32.mrf.mxu3 }
  0xdd   : > { %v381_v23 = vadd.f32 %v380_v21, %v296_v7  ;;  %v410_v24 = vadd.f32 %v409_v22, %v297_v8  ;;  %423 = vst [vmem:[%s943_s23 + $0x28] sm:$0xff] %v352_v20 }
  0xdf   : > { %424 = vst [vmem:[%s943_s23 + $0x30] sm:$0xff] %v381_v23 }
  0xe0   : > { %425 = vst [vmem:[%s943_s23 + $0x38] sm:$0xff] %v410_v24  ;;  %v325_v25 = vpop.f32.mrf.mxu0 }
  0xe1   : > { %v326_v27 = vadd.f32 %v325_v25, %v294_v5 }
  0xe2   : > { %v354_v26 = vpop.f32.mrf.mxu1 }
  0xe3   : > { %v355_v28 = vadd.f32 %v354_v26, %v295_v6  ;;  %426 = vst [vmem:[%s943_s23 + $0x40] sm:$0xff] %v326_v27 }
  0xe4   : > { %v383_v29 = vpop.f32.mrf.mxu2  ;;  %v412_v30 = vpop.f32.mrf.mxu3 }
  0xe5   : > { %v384_v31 = vadd.f32 %v383_v29, %v296_v7  ;;  %v413_v32 = vadd.f32 %v412_v30, %v297_v8  ;;  %427 = vst [vmem:[%s943_s23 + $0x48] sm:$0xff] %v355_v28 }
  0xe7   : > { %428 = vst [vmem:[%s943_s23 + $0x50] sm:$0xff] %v384_v31 }
  0xe8   : > { %429 = vst [vmem:[%s943_s23 + $0x58] sm:$0xff] %v413_v32  ;;  %v328_v33 = vpop.f32.mrf.mxu0 }
  0xe9   : > { %v329_v35 = vadd.f32 %v328_v33, %v294_v5 }
  0xea   : > { %v357_v34 = vpop.f32.mrf.mxu1 }
  0xeb   : > { %v358_v36 = vadd.f32 %v357_v34, %v295_v6  ;;  %430 = vst [vmem:[%s943_s23 + $0x60] sm:$0xff] %v329_v35 }
  0xec   : > { %v386_v37 = vpop.f32.mrf.mxu2  ;;  %v415_v38 = vpop.f32.mrf.mxu3 }
  0xed   : > { %v387_v39 = vadd.f32 %v386_v37, %v296_v7  ;;  %v416_v40 = vadd.f32 %v415_v38, %v297_v8  ;;  %431 = vst [vmem:[%s943_s23 + $0x68] sm:$0xff] %v358_v36 }
  0xef   : > { %432 = vst [vmem:[%s943_s23 + $0x70] sm:$0xff] %v387_v39 }
  0xf0   : > { %433 = vst [vmem:[%s943_s23 + $0x78] sm:$0xff] %v416_v40 }
  0xf1   : > { %755 = shalt.err (!%p752_p10)
}
  0xf2   : > { %s806_s22 = smov 512   ;;  %s807_s25 = smov 32  }
  0xf3   : > { %575 = dma.vmem_to_hbm [thread:$0]  (%p894_p3), %s449_s4, 2048, %s451_s5, %s435_s16, %s806_s22, %s806_s22, %s807_s25  }
  0xf4 PF: > { %s465_s30 = sand.u32 1, %s786_s12   ;;  %p1004_p12 = scmp.ge.s32.totalorder %s798_s15, 2 }
  0xf5   : > { %s466_s18 = scalar_lea.sflag [#allocation4], %s465_s30 }
  0xf6   : > { %p589_p13 = pnand %p1004_p12, %p863_p6 }
  0xf8   : > { %p590_p0 = pneg %p589_p13 }
  0xfa   : > { %781 = dma.done.wait (%p590_p0), %s466_s18, 2048  }
  0xfb   : > { %783 = vsyncadd (%p590_p0), %s466_s18, 4294965248  ;;  %p17_p5 = scmp.ge.s32.totalorder %s884_s6, 4   ;;  %s1005_s12 = smov %s790_s13 }
  0xfc   : > { %s1006_s13 = smov %s794_s14  ;;  %s1007_s14 = smov %s900_s10 }
  0xfd   : > { %s1008_s15 = smov %s884_s6  ;;  %19 = sbr.rel (!%p17_p5) target bundleno = 6 (0x6), region = 85 }
 0x102   :  { %472 = vsyncpa [#allocation3], 1 }
 0x103   :  { %474 = vsyncpa [#allocation3 + $0x1], 1 }
 0x104   :  { %475 = vsyncpa [#allocation6], 1 }
 0x105   :  { %476 = vsyncpa [#allocation4], 1 }
 0x106   :  { %478 = vsyncpa [#allocation4 + $0x1], 1 }

// kernel: tpu_custom_call.1
= control target key start
LH: loop header
LB: loop body
LE: loop exit
PB: predicated region body
PF: predicated region fallthrough
CT: control target
= control target key end

     0   :  { %8 = vsyncpa [#allocation3], 0  ;;  %s995_s0 = inlined_call_operand.hbm [shape: f32[8,8,128], index: 0, kind: input, shape index: {}]   ;;  %s996_s1 = inlined_call_operand.hbm [shape: f32[128,512], index: 1, kind: input, shape index: {}]   ;;  %s997_s2 = inlined_call_operand.hbm [shape: f32[1,512], index: 2, kind: input, shape index: {}]   ;;  %s998_s3 = inlined_call_operand.hbm [shape: f32[8,8,512], index: 3, kind: output, shape index: {}]  }
   0x1   :  { %10 = vsyncpa [#allocation3 + $0x1], 0 }
   0x2   :  { %11 = vsyncpa [#allocation6], 0 }
   0x3   :  { %12 = vsyncpa [#allocation4], 0 }
   0x4   :  { %14 = vsyncpa [#allocation4 + $0x1], 0  ;;  %s828_s12 = smov 0   ;;  %s830_s13 = smov 0  }
   0x5   :  { %s832_s14 = smov 0   ;;  %s834_s15 = smov 0  }
   0x6 LB: > { %s849_s16 = sadd.s32 4294967295, %s798_s15   ;;  %s543_s17 = sadd.s32 4294967294, %s798_s15   ;;  %s798_s15 = sphi %s834_s15, %s1008_s15   ;;  %s794_s14 = sphi %s832_s14, %s1007_s14   ;;  %s790_s13 = sphi %s830_s13, %s1006_s13   ;;  %s786_s12 = sphi %s828_s12, %s1005_s12  }
   0x7   : > { %p40_p0 = scmp.ne.s32.totalorder %s790_s13, %s786_s12  ;;  %p41_p1 = scmp.eq.s32.totalorder %s849_s16, 0 }
   0x8   : > { %p106_p2 = scmp.eq.s32.totalorder %s849_s16, 1  ;;  %p112_p3 = scmp.eq.s32.totalorder %s543_s17, 1 }
   0x9   : > { %p858_p4 = por %p41_p1, %p40_p0  ;;  %p544_p5 = scmp.ge.s32.totalorder %s798_s15, 1 }
   0xa   : > { %p863_p6 = por %p112_p3, %p40_p0  ;;  %p119_p7 = scmp.lt.s32.totalorder %s798_s15, 3 }
   0xb   : > { %s130_s22 = sshll.u32 %s996_s1, 4  ;;  %s800_s24 = smov [#allocation5]   ;;  %s131_s22 = int_to_ptr.hbm [resolvable:$true] %s130_s22 }
   0xc   : > { %p871_p8 = pnand %p544_p5, %p119_p7  ;;  %s132_s25 = sshll.u32 %s800_s24, 4  ;;  %s133_s25 = int_to_ptr.vmem [resolvable:$true] %s132_s25 }
   0xd   : > { %s145_s28 = sshll.u32 %s997_s2, 4  ;;  %s801_s29 = smov 512   ;;  %s146_s28 = int_to_ptr.hbm [resolvable:$true] %s145_s28 }
   0xe   : > { %p577_p9 = pneg %p871_p8  ;;  %s802_s30 = smov 32  }
   0xf   : > { %s803_s4 = smov [#allocation7]   ;;  %s884_s6 = sadd.s32 1, %s798_s15  }
  0x10   : > { %p578_p10 = pnand %p577_p9, %p41_p1  ;;  %s147_s5 = sshll.u32 %s803_s4, 4  ;;  %s148_s5 = int_to_ptr.vmem [resolvable:$true] %s147_s5 }
  0x11   : > { %s27_s7 = sadd.s32 1, %s794_s14  ;;  %s24_s8 = ssub.s32 %s798_s15, %s884_s6 }
  0x12   : > { %580 = dma.hbm_to_vmem [thread:$0]  (!%p578_p10), %s131_s22, 8192, %s133_s25, [#allocation6], %s801_s29, %s801_s29, %s802_s30  }
  0x13   : > { %583 = dma.hbm_to_vmem [thread:$0]  (!%p578_p10), %s146_s28, 64, %s148_s5, [#allocation6]  }
  0x14   : > { %p34_p12 = scmp.ne.s32.totalorder %s794_s14, %s790_s13  ;;  %p25_p13 = scmp.eq.s32.totalorder %s24_s8, 0 }
  0x15   : > { %p35_p0 = scmp.eq.s32.totalorder %s798_s15, 0  ;;  %p594_p5 = scmp.lt.s32.totalorder %s798_s15, 2 }
  0x16   : > { %p894_p3 = por %p106_p2, %p34_p12  ;;  %s158_s11 = sand.u32 1, %s794_s14  }
  0x17   : > { %s900_s10 = scalar_select %p25_p13, %s794_s14, %s27_s7  }
  0x18   : > { %p36_p7 = por %p35_p0, %p34_p12  ;;  %s548_s17 = sshll.u32 %s158_s11, 5 }
  0x19   : > { %s562_s20 = sshll.u32 %s798_s15, 5  ;;  %s162_s25 = scalar_lea.vmem [#allocation2], %s548_s17 }
  0x1a   : > { %s167_s24 = scalar_lea.hbm %s995_s0, %s562_s20  ;;  %s170_s26 = sshll.u32 %s162_s25, 4  ;;  %s171_s26 = int_to_ptr.vmem [resolvable:$true] %s170_s26 }
  0x1b   : > { %s168_s27 = sshll.u32 %s167_s24, 4  ;;  %p907_p2 = pnand %p594_p5, %p36_p7  ;;  %s169_s27 = int_to_ptr.hbm [resolvable:$true] %s168_s27 }
  0x1c   : > { %s159_s29 = scalar_lea.sflag [#allocation3], %s158_s11  ;;  %s698_s30 = sshra.s32 %s169_s27, 4  ;;  %s699_s30 = int_to_ptr.hbm [resolvable:$true] %s698_s30 }
  0x1d   : > { %s700_s4 = scalar_lea.hbm %s699_s30, 32  ;;  %p702_p10 = pneg %p907_p2 }
  0x1e   : > { %p701_p9 = scmp.ne.s32.totalorder %s699_s30, %s700_s4  ;;  %s705_s8 = scalar_lea.hbm %s995_s0, 64 }
  0x1f   : > { %p706_p0 = scmp.lt.s32.totalorder %s699_s30, %s995_s0  ;;  %p707_p5 = scmp.lt.s32.totalorder %s705_s8, %s700_s4 }
  0x20   : > { %p703_p12 = pnand %p702_p10, %p701_p9 }
  0x21   : > { %p708_p7 = por %p707_p5, %p706_p0 }
  0x22   : > { %p704_p13 = pneg %p703_p12 }
  0x24   : > { %p709_p11 = pnand %p708_p7, %p704_p13 }
  0x26   : > { %712 = shalt.err (!%p709_p11)
}
  0x27   : > { %s804_s11 = smov 128   ;;  %s805_s21 = smov 8  }
  0x28   : > { %587 = dma.hbm_to_vmem [thread:$0]  (!%p907_p2), %s169_s27, 512, %s171_s26, %s159_s29, %s804_s11, %s804_s11, %s805_s21  }
  0x29   : > { %182 = sbr.rel (%p871_p8) target bundleno = 244 (0xf4), region = 32  ;;  %s924_s22 = sand.u32 (!%p871_p8), 1, %s790_s13  }
  0x2a   : > { %s552_s24 = sshll.u32 (!%p871_p8), %s924_s22, 5  ;;  %s185_s25 = scalar_lea.sflag (!%p871_p8), [#allocation3], %s924_s22 }
  0x2b   : > { %s928_s30 = scalar_lea.vmem (!%p871_p8), [#allocation2], %s552_s24 }
  0x2e   : > { %773 = dma.done.wait (%p858_p4), %s185_s25, 512  }
  0x2f   : > { %775 = vsyncadd (%p858_p4), %s185_s25, 4294966784 }
  0x30   : > { %777 = dma.done.wait (%p41_p1), [#allocation6], 8256  }
  0x31   : > { %779 = vsyncadd (%p41_p1), [#allocation6], 4294959040  ;;  %v290_v0 = vld [vmem:[#allocation5 + $0x1f0] sm:$0xff]  ;;  %v291_v1 = vld [vmem:[#allocation5 + $0x1f8] sm:$0xff]  ;;  %s555_s18 = sshll.u32 %s924_s22, 7  ;;  %s564_s26 = sshll.u32 %s849_s16, 7 }
  0x32   : > { %v286_v2 = vld [vmem:[#allocation5 + $0x1d0] sm:$0xff]  ;;  %360 = vmatpush.msra.mxu2 %v290_v0  ;;  %389 = vmatpush.msra.mxu3 %v291_v1  ;;  %v287_v3 = vld [vmem:[#allocation5 + $0x1d8] sm:$0xff]  ;;  %v288_v6 = vld [vmem:[#allocation5 + $0x1e0] sm:$0xff]  ;;  %s943_s23 = scalar_lea.vmem [#allocation8], %s555_s18  ;;  %s447_s29 = scalar_lea.hbm %s998_s3, %s564_s26 }
  0x33   : > { %v282_v4 = vld [vmem:[#allocation5 + $0x1b0] sm:$0xff]  ;;  %v283_v5 = vld [vmem:[#allocation5 + $0x1b8] sm:$0xff]  ;;  %v289_v7 = vld [vmem:[#allocation5 + $0x1e8] sm:$0xff]  ;;  %302 = vmatpush.msra.mxu0 %v288_v6  ;;  %s448_s4 = sshll.u32 %s943_s23, 4  ;;  %s450_s5 = sshll.u32 %s447_s29, 4  ;;  %s449_s4 = int_to_ptr.vmem [resolvable:$true] %s448_s4  ;;  %s451_s5 = int_to_ptr.hbm [resolvable:$true] %s450_s5 }
  0x34   : > { %361 = vmatpush.msra.mxu2 %v286_v2  ;;  %390 = vmatpush.msra.mxu3 %v287_v3  ;;  %v284_v8 = vld [vmem:[#allocation5 + $0x1c0] sm:$0xff]  ;;  %v285_v9 = vld [vmem:[#allocation5 + $0x1c8] sm:$0xff]  ;;  %v278_v10 = vld [vmem:[#allocation5 + $0x190] sm:$0xff]  ;;  %s435_s16 = scalar_lea.sflag [#allocation4], %s924_s22  ;;  %s742_s7 = sshra.s32 %s451_s5, 4  ;;  %s743_s7 = int_to_ptr.hbm [resolvable:$true] %s742_s7 }
  0x35   : > { %331 = vmatpush.msra.mxu1 %v289_v7  ;;  %v279_v11 = vld [vmem:[#allocation5 + $0x198] sm:$0xff]  ;;  %v280_v12 = vld [vmem:[#allocation5 + $0x1a0] sm:$0xff]  ;;  %v281_v13 = vld [vmem:[#allocation5 + $0x1a8] sm:$0xff]  ;;  %303 = vmatpush.msra.mxu0 %v284_v8  ;;  %s744_s8 = scalar_lea.hbm %s743_s7, 128  ;;  %s748_s11 = scalar_lea.hbm %s998_s3, 256 }
  0x36   : > { %362 = vmatpush.msra.mxu2 %v282_v4  ;;  %391 = vmatpush.msra.mxu3 %v283_v5  ;;  %v274_v14 = vld [vmem:[#allocation5 + $0x170] sm:$0xff]  ;;  %v275_v15 = vld [vmem:[#allocation5 + $0x178] sm:$0xff]  ;;  %v276_v16 = vld [vmem:[#allocation5 + $0x180] sm:$0xff]  ;;  %p745_p1 = scmp.ne.s32.totalorder %s743_s7, %s744_s8  ;;  %p749_p11 = scmp.lt.s32.totalorder %s743_s7, %s998_s3 }
  0x37   : > { %332 = vmatpush.msra.mxu1 %v285_v9  ;;  %v277_v17 = vld [vmem:[#allocation5 + $0x188] sm:$0xff]  ;;  %304 = vmatpush.msra.mxu0 %v280_v12  ;;  %v270_v18 = vld [vmem:[#allocation5 + $0x150] sm:$0xff]  ;;  %v271_v19 = vld [vmem:[#allocation5 + $0x158] sm:$0xff]  ;;  %p750_p2 = scmp.lt.s32.totalorder %s748_s11, %s744_s8 }
  0x38   : > { %363 = vmatpush.msra.mxu2 %v278_v10  ;;  %392 = vmatpush.msra.mxu3 %v279_v11  ;;  %v272_v20 = vld [vmem:[#allocation5 + $0x160] sm:$0xff]  ;;  %v273_v21 = vld [vmem:[#allocation5 + $0x168] sm:$0xff]  ;;  %v266_v22 = vld [vmem:[#allocation5 + $0x130] sm:$0xff]  ;;  %p746_p4 = pnand %p745_p1, %p894_p3 }
  0x39   : > { %333 = vmatpush.msra.mxu1 %v281_v13  ;;  %305 = vmatpush.msra.mxu0 %v276_v16  ;;  %v267_v23 = vld [vmem:[#allocation5 + $0x138] sm:$0xff]  ;;  %v268_v24 = vld [vmem:[#allocation5 + $0x140] sm:$0xff]  ;;  %v269_v25 = vld [vmem:[#allocation5 + $0x148] sm:$0xff]  ;;  %p751_p9 = por %p750_p2, %p749_p11 }
  0x3a   : > { %364 = vmatpush.msra.mxu2 %v274_v14  ;;  %393 = vmatpush.msra.mxu3 %v275_v15  ;;  %v262_v26 = vld [vmem:[#allocation5 + $0x110] sm:$0xff]  ;;  %v263_v27 = vld [vmem:[#allocation5 + $0x118] sm:$0xff]  ;;  %v264_v28 = vld [vmem:[#allocation5 + $0x120] sm:$0xff]  ;;  %p747_p8 = pneg %p746_p4 }
  0x3b   : > { %334 = vmatpush.msra.mxu1 %v277_v17  ;;  %306 = vmatpush.msra.mxu0 %v272_v20  ;;  %v265_v29 = vld [vmem:[#allocation5 + $0x128] sm:$0xff]  ;;  %v258_v30 = vld [vmem:[#allocation5 + $0xf0] sm:$0xff]  ;;  %v259_v31 = vld [vmem:[#allocation5 + $0xf8] sm:$0xff] }
  0x3c   : > { %365 = vmatpush.msra.mxu2 %v270_v18  ;;  %394 = vmatpush.msra.mxu3 %v271_v19  ;;  %v260_v32 = vld [vmem:[#allocation5 + $0x100] sm:$0xff]  ;;  %v261_v33 = vld [vmem:[#allocation5 + $0x108] sm:$0xff]  ;;  %v254_v34 = vld [vmem:[#allocation5 + $0xd0] sm:$0xff]  ;;  %p752_p10 = pnand %p751_p9, %p747_p8 }
  0x3d   : > { %335 = vmatpush.msra.mxu1 %v273_v21  ;;  %307 = vmatpush.msra.mxu0 %v268_v24  ;;  %v255_v35 = vld [vmem:[#allocation5 + $0xd8] sm:$0xff]  ;;  %v256_v36 = vld [vmem:[#allocation5 + $0xe0] sm:$0xff]  ;;  %v257_v37 = vld [vmem:[#allocation5 + $0xe8] sm:$0xff] }
  0x3e   : > { %366 = vmatpush.msra.mxu2 %v266_v22  ;;  %395 = vmatpush.msra.mxu3 %v267_v23  ;;  %v250_v38 = vld [vmem:[#allocation5 + $0xb0] sm:$0xff]  ;;  %v251_v39 = vld [vmem:[#allocation5 + $0xb8] sm:$0xff]  ;;  %v252_v40 = vld [vmem:[#allocation5 + $0xc0] sm:$0xff] }
  0x3f   : > { %336 = vmatpush.msra.mxu1 %v269_v25  ;;  %308 = vmatpush.msra.mxu0 %v264_v28  ;;  %v253_v41 = vld [vmem:[#allocation5 + $0xc8] sm:$0xff]  ;;  %v246_v42 = vld [vmem:[#allocation5 + $0x90] sm:$0xff]  ;;  %v247_v43 = vld [vmem:[#allocation5 + $0x98] sm:$0xff] }
  0x40   : > { %367 = vmatpush.msra.mxu2 %v262_v26  ;;  %396 = vmatpush.msra.mxu3 %v263_v27  ;;  %v248_v44 = vld [vmem:[#allocation5 + $0xa0] sm:$0xff]  ;;  %v249_v45 = vld [vmem:[#allocation5 + $0xa8] sm:$0xff]  ;;  %v242_v46 = vld [vmem:[#allocation5 + $0x70] sm:$0xff] }
  0x41   : > { %337 = vmatpush.msra.mxu1 %v265_v29  ;;  %309 = vmatpush.msra.mxu0 %v260_v32  ;;  %v243_v47 = vld [vmem:[#allocation5 + $0x78] sm:$0xff]  ;;  %v244_v48 = vld [vmem:[#allocation5 + $0x80] sm:$0xff]  ;;  %v245_v49 = vld [vmem:[#allocation5 + $0x88] sm:$0xff] }
  0x42   : > { %368 = vmatpush.msra.mxu2 %v258_v30  ;;  %397 = vmatpush.msra.mxu3 %v259_v31  ;;  %v238_v50 = vld [vmem:[#allocation5 + $0x50] sm:$0xff]  ;;  %v239_v51 = vld [vmem:[#allocation5 + $0x58] sm:$0xff]  ;;  %v240_v52 = vld [vmem:[#allocation5 + $0x60] sm:$0xff] }
  0x43   : > { %338 = vmatpush.msra.mxu1 %v261_v33  ;;  %310 = vmatpush.msra.mxu0 %v256_v36  ;;  %v241_v53 = vld [vmem:[#allocation5 + $0x68] sm:$0xff]  ;;  %v234_v54 = vld [vmem:[#allocation5 + $0x30] sm:$0xff]  ;;  %v235_v55 = vld [vmem:[#allocation5 + $0x38] sm:$0xff] }
  0x44   : > { %369 = vmatpush.msra.mxu2 %v254_v34  ;;  %398 = vmatpush.msra.mxu3 %v255_v35  ;;  %v236_v56 = vld [vmem:[#allocation5 + $0x40] sm:$0xff]  ;;  %v237_v57 = vld [vmem:[#allocation5 + $0x48] sm:$0xff]  ;;  %v230_v58 = vld [vmem:[#allocation5 + $0x10] sm:$0xff] }
  0x45   : > { %339 = vmatpush.msra.mxu1 %v257_v37  ;;  %311 = vmatpush.msra.mxu0 %v252_v40  ;;  %v231_v59 = vld [vmem:[#allocation5 + $0x18] sm:$0xff]  ;;  %v224_v60 = vld [vmem:[%s928_s30] sm:$0xff]  ;;  %v233_v62 = vld [vmem:[#allocation5 + $0x28] sm:$0xff] }
  0x46   : > { %370 = vmatpush.msra.mxu2 %v250_v38  ;;  %399 = vmatpush.msra.mxu3 %v251_v39  ;;  %v232_v61 = vld [vmem:[#allocation5 + $0x20] sm:$0xff]  ;;  %v229_v0 = vld [vmem:[#allocation5 + $0x8] sm:$0xff]  ;;  %v226_v2 = vld [vmem:[%s928_s30 + $0x10] sm:$0xff] }
  0x47   : > { %340 = vmatpush.msra.mxu1 %v253_v41  ;;  %312 = vmatpush.msra.mxu0 %v248_v44  ;;  %v228_v63 = vld [vmem:[#allocation5] sm:$0xff]  ;;  %v225_v1 = vld [vmem:[%s928_s30 + $0x8] sm:$0xff]  ;;  %v227_v3 = vld [vmem:[%s928_s30 + $0x18] sm:$0xff] }
  0x48   : > { %371 = vmatpush.msra.mxu2 %v246_v42  ;;  %400 = vmatpush.msra.mxu3 %v247_v43  ;;  %v292_v4 = vld [vmem:[#allocation7] sm:$0xf] }
  0x49   : > { %341 = vmatpush.msra.mxu1 %v249_v45  ;;  %313 = vmatpush.msra.mxu0 %v244_v48  ;;  %v294_v5 = vperm.slane %v292_v4, 0  ;;  %v295_v6 = vperm.slane %v292_v4, 1  ;;  %v296_v7 = vperm.slane %v292_v4, 2  ;;  %v297_v8 = vperm.slane %v292_v4, 3 }
  0x4a   : > { %372 = vmatpush.msra.mxu2 %v242_v46  ;;  %401 = vmatpush.msra.mxu3 %v243_v47 }
  0x4b   : > { %342 = vmatpush.msra.mxu1 %v245_v49  ;;  %314 = vmatpush.msra.mxu0 %v240_v52 }
  0x4c   : > { %373 = vmatpush.msra.mxu2 %v238_v50  ;;  %402 = vmatpush.msra.mxu3 %v239_v51 }
  0x4d   : > { %343 = vmatpush.msra.mxu1 %v241_v53  ;;  %315 = vmatpush.msra.mxu0 %v236_v56 }
  0x4e   : > { %374 = vmatpush.msra.mxu2 %v234_v54  ;;  %403 = vmatpush.msra.mxu3 %v235_v55 }
  0x4f   : > { %344 = vmatpush.msra.mxu1 %v237_v57  ;;  %316 = vmatpush.msra.mxu0 %v232_v61 }
  0x50   : > { %375 = vmatpush.msra.mxu2 %v230_v58  ;;  %404 = vmatpush.msra.mxu3 %v231_v59 }
  0x51   : > { %376 = vmatmul.f32.vlgmr.msra.gmra.mxu2 %v224_v60  ;;  %405 = vmatmul.f32.vlgmr.msra.gmra.mxu3 %v224_v60 }
  0x52   : > { %345 = vmatpush.msra.mxu1 %v233_v62  ;;  %317 = vmatpush.msra.mxu0 %v228_v63 }
  0x53   : > { %318 = vmatmul.f32.vlgmr.msra.gmra.mxu0 %v224_v60 }
  0x54   : > { %346 = vmatpush.msra.mxu1 %v229_v0 }
  0x55   : > { %347 = vmatmul.f32.vlgmr.msra.gmra.mxu1 %v224_v60 }
  0x59   : > { %379 = vmatmul.f32.gmra.mxu2 %v225_v1  ;;  %408 = vmatmul.f32.gmra.mxu3 %v225_v1 }
  0x5b   : > { %321 = vmatmul.f32.gmra.mxu0 %v225_v1 }
  0x5d   : > { %350 = vmatmul.f32.gmra.mxu1 %v225_v1 }
  0x61   : > { %382 = vmatmul.f32.gmra.mxu2 %v226_v2  ;;  %411 = vmatmul.f32.gmra.mxu3 %v226_v2 }
  0x63   : > { %324 = vmatmul.f32.gmra.mxu0 %v226_v2 }
  0x65   : > { %353 = vmatmul.f32.gmra.mxu1 %v226_v2 }
  0x69   : > { %385 = vmatmul.f32.gmra.mxu2 %v227_v3  ;;  %414 = vmatmul.f32.gmra.mxu3 %v227_v3 }
  0x6b   : > { %327 = vmatmul.f32.gmra.mxu0 %v227_v3 }
  0x6d   : > { %356 = vmatmul.f32.gmra.mxu1 %v227_v3 }
  0xd0   : > { %v319_v9 = vpop.f32.mrf.mxu0 }
  0xd1   : > { %v320_v11 = vadd.f32 %v319_v9, %v294_v5 }
  0xd2   : > { %v348_v10 = vpop.f32.mrf.mxu1 }
  0xd3   : > { %v349_v12 = vadd.f32 %v348_v10, %v295_v6  ;;  %418 = vst [vmem:[%s943_s23] sm:$0xff] %v320_v11 }
  0xd4   : > { %v377_v13 = vpop.f32.mrf.mxu2  ;;  %v406_v14 = vpop.f32.mrf.mxu3 }
  0xd5   : > { %v378_v15 = vadd.f32 %v377_v13, %v296_v7  ;;  %v407_v16 = vadd.f32 %v406_v14, %v297_v8  ;;  %419 = vst [vmem:[%s943_s23 + $0x8] sm:$0xff] %v349_v12 }
  0xd7   : > { %420 = vst [vmem:[%s943_s23 + $0x10] sm:$0xff] %v378_v15 }
  0xd8   : > { %421 = vst [vmem:[%s943_s23 + $0x18] sm:$0xff] %v407_v16  ;;  %v322_v17 = vpop.f32.mrf.mxu0 }
  0xd9   : > { %v323_v19 = vadd.f32 %v322_v17, %v294_v5 }
  0xda   : > { %v351_v18 = vpop.f32.mrf.mxu1 }
  0xdb   : > { %v352_v20 = vadd.f32 %v351_v18, %v295_v6  ;;  %422 = vst [vmem:[%s943_s23 + $0x20] sm:$0xff] %v323_v19 }
  0xdc   : > { %v380_v21 = vpop.f32.mrf.mxu2  ;;  %v409_v22 = vpop.f32.mrf.mxu3 }
  0xdd   : > { %v381_v23 = vadd.f32 %v380_v21, %v296_v7  ;;  %v410_v24 = vadd.f32 %v409_v22, %v297_v8  ;;  %423 = vst [vmem:[%s943_s23 + $0x28] sm:$0xff] %v352_v20 }
  0xdf   : > { %424 = vst [vmem:[%s943_s23 + $0x30] sm:$0xff] %v381_v23 }
  0xe0   : > { %425 = vst [vmem:[%s943_s23 + $0x38] sm:$0xff] %v410_v24  ;;  %v325_v25 = vpop.f32.mrf.mxu0 }
  0xe1   : > { %v326_v27 = vadd.f32 %v325_v25, %v294_v5 }
  0xe2   : > { %v354_v26 = vpop.f32.mrf.mxu1 }
  0xe3   : > { %v355_v28 = vadd.f32 %v354_v26, %v295_v6  ;;  %426 = vst [vmem:[%s943_s23 + $0x40] sm:$0xff] %v326_v27 }
  0xe4   : > { %v383_v29 = vpop.f32.mrf.mxu2  ;;  %v412_v30 = vpop.f32.mrf.mxu3 }
  0xe5   : > { %v384_v31 = vadd.f32 %v383_v29, %v296_v7  ;;  %v413_v32 = vadd.f32 %v412_v30, %v297_v8  ;;  %427 = vst [vmem:[%s943_s23 + $0x48] sm:$0xff] %v355_v28 }
  0xe7   : > { %428 = vst [vmem:[%s943_s23 + $0x50] sm:$0xff] %v384_v31 }
  0xe8   : > { %429 = vst [vmem:[%s943_s23 + $0x58] sm:$0xff] %v413_v32  ;;  %v328_v33 = vpop.f32.mrf.mxu0 }
  0xe9   : > { %v329_v35 = vadd.f32 %v328_v33, %v294_v5 }
  0xea   : > { %v357_v34 = vpop.f32.mrf.mxu1 }
  0xeb   : > { %v358_v36 = vadd.f32 %v357_v34, %v295_v6  ;;  %430 = vst [vmem:[%s943_s23 + $0x60] sm:$0xff] %v329_v35 }
  0xec   : > { %v386_v37 = vpop.f32.mrf.mxu2  ;;  %v415_v38 = vpop.f32.mrf.mxu3 }
  0xed   : > { %v387_v39 = vadd.f32 %v386_v37, %v296_v7  ;;  %v416_v40 = vadd.f32 %v415_v38, %v297_v8  ;;  %431 = vst [vmem:[%s943_s23 + $0x68] sm:$0xff] %v358_v36 }
  0xef   : > { %432 = vst [vmem:[%s943_s23 + $0x70] sm:$0xff] %v387_v39 }
  0xf0   : > { %433 = vst [vmem:[%s943_s23 + $0x78] sm:$0xff] %v416_v40 }
  0xf1   : > { %755 = shalt.err (!%p752_p10)
}
  0xf2   : > { %s806_s22 = smov 512   ;;  %s807_s25 = smov 32  }
  0xf3   : > { %575 = dma.vmem_to_hbm [thread:$0]  (%p894_p3), %s449_s4, 2048, %s451_s5, %s435_s16, %s806_s22, %s806_s22, %s807_s25  }
  0xf4 PF: > { %s465_s30 = sand.u32 1, %s786_s12   ;;  %p1004_p12 = scmp.ge.s32.totalorder %s798_s15, 2 }
  0xf5   : > { %s466_s18 = scalar_lea.sflag [#allocation4], %s465_s30 }
  0xf6   : > { %p589_p13 = pnand %p1004_p12, %p863_p6 }
  0xf8   : > { %p590_p0 = pneg %p589_p13 }
  0xfa   : > { %781 = dma.done.wait (%p590_p0), %s466_s18, 2048  }
  0xfb   : > { %783 = vsyncadd (%p590_p0), %s466_s18, 4294965248  ;;  %p17_p5 = scmp.ge.s32.totalorder %s884_s6, 4   ;;  %s1005_s12 = smov %s790_s13 }
  0xfc   : > { %s1006_s13 = smov %s794_s14  ;;  %s1007_s14 = smov %s900_s10 }
  0xfd   : > { %s1008_s15 = smov %s884_s6  ;;  %19 = sbr.rel (!%p17_p5) target bundleno = 6 (0x6), region = 85 }
 0x102   :  { %472 = vsyncpa [#allocation3], 1 }
 0x103   :  { %474 = vsyncpa [#allocation3 + $0x1], 1 }
 0x104   :  { %475 = vsyncpa [#allocation6], 1 }
 0x105   :  { %476 = vsyncpa [#allocation4], 1 }
 0x106   :  { %478 = vsyncpa [#allocation4 + $0x1], 1 }

</bundles_post_ra>
